<compile_context>
chip_gen: v5e
topology: v5e:2x2
jax: 0.10.0
libtpu: 0.0.40
codegen_flags: <defaults>
</compile_context>

<pallas_src>
import jax
import jax.numpy as jnp
from jax.experimental import pallas as pl
from jax.experimental.pallas import tpu as pltpu


def _round_up(n, m):
    return -(-n // m) * m


# -----------------------------------------------------------------------------
# Pallas kernel: tiled squared pairwise Euclidean distances (flag edge values)
# -----------------------------------------------------------------------------
def _pairwise_sqdist_kernel(xi_ref, xjt_ref, d_ref):
    """Compute one (TM, TN) output tile of squared distances.

    xi_ref : (TM, D)   row block of points (auto-pipelined BlockSpec).
    xjt_ref: (D, Npc)  ALL points, pre-transposed, VMEM-resident for the whole
                       grid (constant index_map -> fetched once).
    d_ref  : (TM, TN)  output tile (squared distances; sqrt deferred).
    """
    tm, tn = d_ref.shape
    ndim = xi_ref.shape[1]                              # static (1..3), unrolled
    col0 = pl.multiple_of(pl.program_id(1) * tn, tn)    # aligned lane offset
    xi = xi_ref[...]                                    # (TM, D) f32
    xjt = xjt_ref[:, pl.ds(col0, tn)]                   # (D, TN) slice, resident
    # D broadcast-difference VPU passes; the (TM,1)->(TM,TN) lane broadcast and
    # the (1,TN) sublane (stride-0) broadcast should stay off the VALU slot so
    # the kernel remains HBM-writeback bound on v6e/v7x.
    diff = xi[:, 0:1] - xjt[0:1, :]                     # (TM,1)-(1,TN)->(TM,TN)
    acc = diff * diff
    for k in range(1, ndim):
        diff = xi[:, k:k + 1] - xjt[k:k + 1, :]
        acc = acc + diff * diff
    d_ref[...] = acc


def pairwise_sq_distances_padded(x):
    """x: (N, D) f32 -> (Np, Np) *squared* distance matrix, Np = round_up(N,128).

    Rows/cols >= N belong to zero-padded phantom points; the consumer must mask
    them. Returning the padded matrix (instead of slicing [:N,:N]) avoids an
    extra N^2 HBM read + write.
    """
    x = jnp.asarray(x, jnp.float32)
    N, D = x.shape

    Np = max(128, _round_up(N, 128))       # lane-dense output, minimal padding
    TM = TN = min(1024, Np)                # 4 MiB tile, 8 MiB double-buffered
    Npc = _round_up(Np, TN)                # resident xjt padded to a TN multiple
                                           # so the in-kernel pl.ds never leaves it

    xi = jnp.zeros((Np, D), jnp.float32).at[:N, :].set(x)
    xjt = jnp.zeros((D, Npc), jnp.float32).at[:, :N].set(x.T)

    grid = (pl.cdiv(Np, TM), pl.cdiv(Np, TN))   # ragged last block handled by Pallas

    cost = pl.CostEstimate(
        flops=3 * D * Np * Np,
        transcendentals=0,
        bytes_accessed=4 * Np * Np + 4 * Np * D + 4 * Npc * D,
    )

    return pl.pallas_call(
        _pairwise_sqdist_kernel,
        out_shape=jax.ShapeDtypeStruct((Np, Np), jnp.float32),
        grid=grid,
        in_specs=[
            pl.BlockSpec((TM, D), lambda i, j: (i, 0)),    # small row-block DMA
            pl.BlockSpec((D, Npc), lambda i, j: (0, 0)),   # resident, fetched once
        ],
        out_specs=pl.BlockSpec((TM, TN), lambda i, j: (i, j)),
        compiler_params=pltpu.CompilerParams(
            dimension_semantics=("parallel", "parallel"),  # megacore on v7x
            vmem_limit_bytes=32 * 1024 * 1024,
        ),
        cost_estimate=cost,
    )(xi, xjt)


def pairwise_sq_distances(x):
    """(N, N) squared-distance matrix (testing convenience; the persistence path
    uses the padded matrix directly and never materializes this slice)."""
    N = x.shape[0]
    return pairwise_sq_distances_padded(x)[:N, :N]


# -----------------------------------------------------------------------------
# Glue: H0 persistence of the flag filtration = MST edge weights (Prim's)
# -----------------------------------------------------------------------------
def _mst_edge_sq_weights(D2, n_valid):
    """Prim's algorithm on the (possibly padded) squared-distance matrix.

    sqrt is monotone, so the MST (and the order of merge events) on squared
    distances is identical to the MST on true distances. Indices >= n_valid are
    zero-padded phantom points and are pre-marked as in-tree / +inf so they can
    never be selected. Returns (n_valid-1,) squared edge weights.
    """
    Np = D2.shape[0]
    padded = jnp.arange(Np) >= n_valid
    in_tree = padded.at[0].set(True)                 # start at vertex 0
    mind = jnp.where(padded, jnp.inf, D2[0])
    weights = jnp.zeros((max(n_valid - 1, 0),), jnp.float32)

    def body(i, state):
        in_tree, mind, weights = state
        masked = jnp.where(in_tree, jnp.inf, mind)
        j = jnp.argmin(masked)
        w = masked[j]
        weights = weights.at[i].set(w)
        in_tree = in_tree.at[j].set(True)
        mind = jnp.minimum(mind, D2[j])
        return in_tree, mind, weights

    _, _, weights = jax.lax.fori_loop(0, n_valid - 1, body,
                                      (in_tree, mind, weights))
    return weights
    # TODO(synk): at large N, fuse Prim into the Pallas kernel (stream one
    # TM-row distance block per grid step, keep in_tree/mind in VMEM/SMEM
    # scratch) so the (Np, Np) matrix is never materialized in HBM: O(N*D)
    # traffic instead of O(N^2).


def _alpha_h0_diagram_impl(x):
    N = x.shape[0]
    D2 = pairwise_sq_distances_padded(x)              # Pallas hot path (padded)
    sq = jnp.sort(_mst_edge_sq_weights(D2, N))        # sorted squared merges
    deaths = jnp.sqrt(sq)                             # sqrt on N-1 values only
    deaths = jnp.concatenate([deaths, jnp.array([jnp.inf], jnp.float32)])
    births = jnp.zeros((N,), jnp.float32)             # vertices enter at 0
    return jnp.stack([births, deaths], axis=-1)       # (N, 2)


_alpha_h0_diagram = jax.jit(_alpha_h0_diagram_impl)


# -----------------------------------------------------------------------------
# AlphaLayer equivalent
# -----------------------------------------------------------------------------
class AlphaLayer:
    """Alpha persistence layer (no learnable parameters)."""

    def __init__(self, maxdim=0, alg='hom'):
        self.maxdim = maxdim
        self.alg = alg  # 'hom' and 'cohom' yield identical diagrams

    def __call__(self, x):
        # x: (N, D) point cloud; D == 1 follows the 1-D chain-complex path of
        # the reference, but its H0 diagram coincides with the MST formulation.
        dgms = [_alpha_h0_diagram(jnp.asarray(x, jnp.float32))]
        # TODO(synk): maxdim > 0 (Delaunay triangulation + boundary-matrix
        # persistence reduction) is combinatorial / host-side in the reference
        # and has no clean Pallas equivalent; only the H0 diagram is produced.
        return dgms, True


if __name__ == "__main__":
    key = jax.random.PRNGKey(0)
    layer = AlphaLayer(maxdim=0, alg='hom')

    # 2-D point cloud path (reference: delaunay_complex + FlagDiagram).
    x2d = jax.random.normal(key, (16, 2), dtype=jnp.float32)
    dgms2d, is_sub = layer(x2d)
    dgm0 = jax.block_until_ready(dgms2d[0])
    assert dgm0.shape == (16, 2) and is_sub

    # 1-D point cloud path (reference: delaunay_complex_1d + FlagDiagram).
    x1d = jax.random.normal(jax.random.PRNGKey(1), (16, 1), dtype=jnp.float32)
    dgms1d, _ = layer(x1d)
    dgm0_1d = jax.block_until_ready(dgms1d[0])
    assert dgm0_1d.shape == (16, 2)

    # 1-D semantics check: finite H0 deaths == sorted consecutive gaps.
    xs = jnp.sort(x1d[:, 0])
    gaps = jnp.sort(xs[1:] - xs[:-1])
    assert jnp.allclose(dgm0_1d[:-1, 1], gaps, atol=1e-5)

    # Pallas kernel vs pure-JAX squared distances.
    d2_ref = jnp.sum((x2d[:, None, :] - x2d[None, :, :]) ** 2, axis=-1)
    d2_ker = jax.block_until_ready(pairwise_sq_distances(x2d))
    assert jnp.allclose(d2_ker, d2_ref, atol=1e-5)

    # Larger cloud exercising the padded-matrix masking in the Prim consumer.
    x3d = jax.random.normal(jax.random.PRNGKey(2), (200, 3), dtype=jnp.float32)
    dgm_big = jax.block_until_ready(layer(x3d)[0][0])
    d2_full = jnp.sum((x3d[:, None, :] - x3d[None, :, :]) ** 2, axis=-1)
    w_ref = jnp.sqrt(jnp.sort(_mst_edge_sq_weights(d2_full, 200)))
    assert jnp.allclose(dgm_big[:-1, 1], w_ref, atol=1e-4, rtol=1e-4)

    print("KERNEL_OK")
</pallas_src>

<mosaic_0001>
module attributes {stable_mosaic.version = 11 : i64} {
  func.func @_pairwise_sqdist_kernel(%arg0: i32, %arg1: i32, %arg2: memref<128x2xf32, #tpu.memory_space<vmem>>, %arg3: memref<2x128xf32, #tpu.memory_space<vmem>>, %arg4: memref<128x128xf32, #tpu.memory_space<vmem>>) attributes {dimension_semantics = [#tpu.dimension_semantics<parallel>, #tpu.dimension_semantics<parallel>], iteration_bounds = array<i64: 1, 1>, scalar_prefetch = 0 : i64, scratch_operands = 0 : i64, tpu.core_type = #tpu.core_type<tc>, window_params = [{transform_indices = @transform_0, window_bounds = array<i64: 128, 2>}, {pipeline_mode = #tpu.pipeline_mode<synchronous>, transform_indices = @transform_1, window_bounds = array<i64: 2, 128>}, {transform_indices = @transform_2, window_bounds = array<i64: 128, 128>}]} {
    %c128_i32 = arith.constant 128 : i32
    %0 = arith.muli %arg1, %c128_i32 : i32
    %1 = tpu.assume_multiple %0, 128 : i32
    %c0 = arith.constant 0 : index
    %c0_0 = arith.constant 0 : index
    %2 = vector.load %arg2[%c0, %c0_0] : memref<128x2xf32, #tpu.memory_space<vmem>>, vector<128x2xf32>
    %c0_1 = arith.constant 0 : index
    %3 = arith.index_cast %1 : i32 to index
    %4 = vector.load %arg3[%c0_1, %3] : memref<2x128xf32, #tpu.memory_space<vmem>>, vector<2x128xf32>
    %5 = vector.extract_strided_slice %2 {offsets = [0, 0], sizes = [128, 1], strides = [1, 1]} : vector<128x2xf32> to vector<128x1xf32>
    %6 = vector.extract_strided_slice %4 {offsets = [0, 0], sizes = [1, 128], strides = [1, 1]} : vector<2x128xf32> to vector<1x128xf32>
    %7 = vector.broadcast %5 : vector<128x1xf32> to vector<128x128xf32>
    %8 = vector.broadcast %6 : vector<1x128xf32> to vector<128x128xf32>
    %9 = arith.subf %7, %8 : vector<128x128xf32>
    %10 = arith.mulf %9, %9 : vector<128x128xf32>
    %11 = vector.extract_strided_slice %2 {offsets = [0, 1], sizes = [128, 1], strides = [1, 1]} : vector<128x2xf32> to vector<128x1xf32>
    %12 = vector.extract_strided_slice %4 {offsets = [1, 0], sizes = [1, 128], strides = [1, 1]} : vector<2x128xf32> to vector<1x128xf32>
    %13 = vector.broadcast %11 : vector<128x1xf32> to vector<128x128xf32>
    %14 = vector.broadcast %12 : vector<1x128xf32> to vector<128x128xf32>
    %15 = arith.subf %13, %14 : vector<128x128xf32>
    %16 = arith.mulf %15, %15 : vector<128x128xf32>
    %17 = arith.addf %10, %16 : vector<128x128xf32>
    %c0_2 = arith.constant 0 : index
    %c0_3 = arith.constant 0 : index
    %18 = vector.load %arg4[%c0_2, %c0_3] : memref<128x128xf32, #tpu.memory_space<vmem>>, vector<128x128xf32>
    tpu.vector_store %arg4[%c0_2, %c0_3], %17 {strides = array<i32>} : memref<128x128xf32, #tpu.memory_space<vmem>>, vector<128x128xf32>,
    return
  }
  func.func @transform_0(%arg0: i32, %arg1: i32) -> (i32, i32) {
    %c0_i32 = arith.constant 0 : i32
    %c0_i32_0 = arith.constant 0 : i32
    return %arg0, %c0_i32 : i32, i32
  }
  func.func @transform_1(%arg0: i32, %arg1: i32) -> (i32, i32) {
    %c0_i32 = arith.constant 0 : i32
    %c0_i32_0 = arith.constant 0 : i32
    %c0_i32_1 = arith.constant 0 : i32
    return %c0_i32, %c0_i32_0 : i32, i32
  }
  func.func @transform_2(%arg0: i32, %arg1: i32) -> (i32, i32) {
    %c0_i32 = arith.constant 0 : i32
    return %arg0, %arg1 : i32, i32
  }
}

</mosaic_0001>

<bundles_post_ra>
// kernel: _alpha_h0_diagram_impl.1
= control target key start
LH: loop header
LB: loop body
LE: loop exit
PB: predicated region body
PF: predicated region fallthrough
CT: control target
= control target key end

     0   :  { %v287_v0 = vmov 0   ;;  %v288_v17 = vmov 1   ;;  %s461_s0 = inlined_call_operand.vmem [shape: f32[128,2], index: 0, kind: input, shape index: {}]   ;;  %s462_s1 = inlined_call_operand.vmem [shape: f32[2,128], index: 1, kind: input, shape index: {}]   ;;  %s463_s2 = inlined_call_operand.vmem [shape: f32[128,128], index: 2, kind: output, shape index: {}]  }
   0x1   :  { %283 = vset.pattern.permute.xlu2 %v287_v0  ;;  %282 = vset.pattern.permute.xlu1 %v287_v0  ;;  %v16_v1 = vld [vmem:[%s461_s0 + $0x20] sm:$0xff]  ;;  %v14_v2 = vld [vmem:[%s461_s0 + $0x10] sm:$0xff]  ;;  %v17_v4 = vld [vmem:[%s461_s0 + $0x28] sm:$0xff] }
   0x2   :  { %v12_v3 = vld [vmem:[%s461_s0] sm:$0xff]  ;;  %281 = vset.pattern.permute.xlu0 %v287_v0  ;;  %54 = vperm.xlu2 %283, %v16_v1   ;;  %v15_v5 = vld [vmem:[%s461_s0 + $0x18] sm:$0xff]  ;;  %v13_v6 = vld [vmem:[%s461_s0 + $0x8] sm:$0xff] }
   0x3   :  { %44 = vperm.xlu1 %282, %v14_v2   ;;  %34 = vperm.xlu0 %281, %v12_v3   ;;  %v20_v7 = vld [vmem:[%s461_s0 + $0x40] sm:$0xff]  ;;  %v19_v8 = vld [vmem:[%s461_s0 + $0x38] sm:$0xff]  ;;  %v18_v9 = vld [vmem:[%s461_s0 + $0x30] sm:$0xff] }
   0x4   :  { %v23_v10 = vld [vmem:[%s461_s0 + $0x58] sm:$0xff]  ;;  %v22_v11 = vld [vmem:[%s461_s0 + $0x50] sm:$0xff]  ;;  %v21_v12 = vld [vmem:[%s461_s0 + $0x48] sm:$0xff] }
   0x5   :  { %v26_v13 = vld [vmem:[%s461_s0 + $0x70] sm:$0xff]  ;;  %v25_v14 = vld [vmem:[%s461_s0 + $0x68] sm:$0xff]  ;;  %v24_v15 = vld [vmem:[%s461_s0 + $0x60] sm:$0xff] }
   0x6   :  { %v27_v16 = vld [vmem:[%s461_s0 + $0x78] sm:$0xff]  ;;  %v31_v24 = vld [vmem:[%s462_s1] sm:$0x3] }
   0x7   :  { %v361_v25 = vperm.slane %v31_v24, 0  ;;  %v366_v30 = vperm.slane %v31_v24, 1 }
   0xa   :  { %59 = vperm.xlu2 %283, %v17_v4  }
   0xb   :  { %49 = vperm.xlu1 %282, %v15_v5   ;;  %39 = vperm.xlu0 %281, %v13_v6  }
  0x12   :  { %74 = vperm.xlu2 %283, %v20_v7  }
  0x13   :  { %69 = vperm.xlu1 %282, %v19_v8   ;;  %64 = vperm.xlu0 %281, %v18_v9  }
  0x1a   :  { %89 = vperm.xlu2 %283, %v23_v10  }
  0x1b   :  { %84 = vperm.xlu1 %282, %v22_v11   ;;  %79 = vperm.xlu0 %281, %v21_v12  }
  0x22   :  { %104 = vperm.xlu2 %283, %v26_v13  }
  0x23   :  { %99 = vperm.xlu1 %282, %v25_v14   ;;  %94 = vperm.xlu0 %281, %v24_v15  }
  0x2a   :  { %285 = vset.pattern.permute.xlu2 %v288_v17 }
  0x2b   :  { %284 = vset.pattern.permute.xlu1 %v288_v17  ;;  %109 = vperm.xlu0 %281, %v27_v16  }
  0x2c   :  { %150 = vperm.xlu2 %285, %v13_v6   ;;  %146 = vperm.xlu1 %284, %v12_v3  }
  0x33   :  { %286 = vset.pattern.permute.xlu0 %v288_v17 }
  0x34   :  { %162 = vperm.xlu2 %285, %v16_v1   ;;  %158 = vperm.xlu1 %284, %v15_v5  }
  0x35   :  { %154 = vperm.xlu0 %286, %v14_v2  }
  0x3c   :  { %170 = vperm.xlu2 %285, %v18_v9   ;;  %166 = vperm.xlu1 %284, %v17_v4  }
  0x3d   :  { %174 = vperm.xlu0 %286, %v19_v8  }
  0x44   :  { %182 = vperm.xlu2 %285, %v21_v12   ;;  %178 = vperm.xlu1 %284, %v20_v7  }
  0x45   :  { %186 = vperm.xlu0 %286, %v22_v11  }
  0x4c   :  { %194 = vperm.xlu2 %285, %v24_v15   ;;  %190 = vperm.xlu1 %284, %v23_v10  }
  0x4d   :  { %198 = vperm.xlu0 %286, %v25_v14  }
  0x54   :  { %206 = vperm.xlu2 %285, %v27_v16   ;;  %202 = vperm.xlu1 %284, %v26_v13  }
  0x5c   :  { %v55_v18 = vpop.permute.xlu2 %54 }
  0x5d   :  { %v117_v39 = vsub.f32 %v55_v18, %v361_v25 }
  0x5f   :  { %v133_v44 = vmul.f32 %v117_v39, %v117_v39 }
  0x64   :  { %v352_v19 = vpop.permute.xlu2 %59 }
  0x6c   :  { %v354_v20 = vpop.permute.xlu2 %74 }
  0x74   :  { %v356_v21 = vpop.permute.xlu2 %89 }
  0x75   :  { %v45_v22 = vpop.permute.xlu1 %44  ;;  %v35_v23 = vpop.permute.xlu0 %34 }
  0x76   :  { %v113_v55 = vsub.f32 %v35_v23, %v361_v25  ;;  %v115_v6 = vsub.f32 %v45_v22, %v361_v25 }
  0x78   :  { %v129_v62 = vmul.f32 %v113_v55, %v113_v55  ;;  %v131_v17 = vmul.f32 %v115_v6, %v115_v6 }
  0x7c   :  { %v105_v26 = vpop.permute.xlu2 %104 }
  0x7d   :  { %v364_v27 = vsub.f32 %v105_v26, %v361_v25  ;;  %v50_v28 = vpop.permute.xlu1 %49  ;;  %v40_v29 = vpop.permute.xlu0 %39  ;;  %v118_v26 = vsub.f32 %v352_v19, %v361_v25 }
  0x7e   :  { %v114_v31 = vsub.f32 %v40_v29, %v361_v25  ;;  %v116_v4 = vsub.f32 %v50_v28, %v361_v25 }
  0x80   :  { %v130_v36 = vmul.f32 %v114_v31, %v114_v31  ;;  %v132_v13 = vmul.f32 %v116_v4, %v116_v4  ;;  %v143_v4 = vmul.f32 %v364_v27, %v364_v27 }
  0x85   :  { %v369_v32 = vpop.permute.xlu1 %69  ;;  %v65_v33 = vpop.permute.xlu0 %64 }
  0x86   :  { %v151_v34 = vpop.permute.xlu2 %150  ;;  %v119_v47 = vsub.f32 %v65_v33, %v361_v25  ;;  %v120_v29 = vsub.f32 %v369_v32, %v361_v25 }
  0x87   :  { %v211_v35 = vsub.f32 %v151_v34, %v366_v30 }
  0x88   :  { %v135_v52 = vmul.f32 %v119_v47, %v119_v47 }
  0x89   :  { %v227_v37 = vmul.f32 %v211_v35, %v211_v35 }
  0x8b   :  { %v243_v38 = vadd.f32 %v227_v37, %v130_v36  ;;  %v134_v37 = vmul.f32 %v118_v26, %v118_v26 }
  0x8d   :  { %259 = vst [vmem:[%s463_s2 + $0x8] sm:$0xff] %v243_v38  ;;  %v376_v40 = vpop.permute.xlu1 %84  ;;  %v80_v41 = vpop.permute.xlu0 %79 }
  0x8e   :  { %v163_v42 = vpop.permute.xlu2 %162  ;;  %v122_v56 = vsub.f32 %v80_v41, %v361_v25  ;;  %v136_v41 = vmul.f32 %v120_v29, %v120_v29  ;;  %v123_v47 = vsub.f32 %v376_v40, %v361_v25 }
  0x8f   :  { %v214_v43 = vsub.f32 %v163_v42, %v366_v30 }
  0x90   :  { %v138_v63 = vmul.f32 %v122_v56, %v122_v56 }
  0x91   :  { %v230_v45 = vmul.f32 %v214_v43, %v214_v43 }
  0x93   :  { %v246_v46 = vadd.f32 %v230_v45, %v133_v44 }
  0x95   :  { %262 = vst [vmem:[%s463_s2 + $0x20] sm:$0xff] %v246_v46  ;;  %v383_v48 = vpop.permute.xlu1 %99  ;;  %v95_v49 = vpop.permute.xlu0 %94  ;;  %v121_v46 = vsub.f32 %v354_v20, %v361_v25 }
  0x96   :  { %v171_v50 = vpop.permute.xlu2 %170  ;;  %v125_v5 = vsub.f32 %v95_v49, %v361_v25 }
  0x97   :  { %v216_v51 = vsub.f32 %v171_v50, %v366_v30 }
  0x98   :  { %v141_v14 = vmul.f32 %v125_v5, %v125_v5 }
  0x99   :  { %v232_v53 = vmul.f32 %v216_v51, %v216_v51 }
  0x9b   :  { %v248_v54 = vadd.f32 %v232_v53, %v135_v52  ;;  %v137_v52 = vmul.f32 %v121_v46, %v121_v46 }
  0x9d   :  { %264 = vst [vmem:[%s463_s2 + $0x30] sm:$0xff] %v248_v54  ;;  %v110_v57 = vpop.permute.xlu0 %109  ;;  %v139_v54 = vmul.f32 %v123_v47, %v123_v47 }
  0x9e   :  { %v183_v58 = vpop.permute.xlu2 %182  ;;  %v147_v59 = vpop.permute.xlu1 %146  ;;  %v128_v28 = vsub.f32 %v110_v57, %v361_v25  ;;  %v124_v57 = vsub.f32 %v356_v21, %v361_v25 }
  0x9f   :  { %v219_v60 = vsub.f32 %v183_v58, %v366_v30  ;;  %v210_v61 = vsub.f32 %v147_v59, %v366_v30  ;;  %v126_v58 = vsub.f32 %v383_v48, %v361_v25 }
  0xa0   :  { %v144_v38 = vmul.f32 %v128_v28, %v128_v28 }
  0xa1   :  { %v235_v0 = vmul.f32 %v219_v60, %v219_v60  ;;  %v226_v1 = vmul.f32 %v210_v61, %v210_v61  ;;  %v142_v21 = vmul.f32 %v126_v58, %v126_v58 }
  0xa3   :  { %v251_v2 = vadd.f32 %v235_v0, %v138_v63  ;;  %v242_v3 = vadd.f32 %v226_v1, %v129_v62  ;;  %v140_v63 = vmul.f32 %v124_v57, %v124_v57 }
  0xa5   :  { %267 = vst [vmem:[%s463_s2 + $0x48] sm:$0xff] %v251_v2 }
  0xa6   :  { %258 = vst [vmem:[%s463_s2] sm:$0xff] %v242_v3  ;;  %v195_v7 = vpop.permute.xlu2 %194  ;;  %v159_v8 = vpop.permute.xlu1 %158 }
  0xa7   :  { %v222_v9 = vsub.f32 %v195_v7, %v366_v30  ;;  %v213_v10 = vsub.f32 %v159_v8, %v366_v30  ;;  %v155_v11 = vpop.permute.xlu0 %154 }
  0xa8   :  { %v212_v12 = vsub.f32 %v155_v11, %v366_v30 }
  0xa9   :  { %v238_v15 = vmul.f32 %v222_v9, %v222_v9  ;;  %v229_v16 = vmul.f32 %v213_v10, %v213_v10 }
  0xaa   :  { %v228_v18 = vmul.f32 %v212_v12, %v212_v12 }
  0xab   :  { %v254_v22 = vadd.f32 %v238_v15, %v141_v14  ;;  %v245_v23 = vadd.f32 %v229_v16, %v132_v13 }
  0xac   :  { %v244_v24 = vadd.f32 %v228_v18, %v131_v17 }
  0xad   :  { %270 = vst [vmem:[%s463_s2 + $0x60] sm:$0xff] %v254_v22 }
  0xae   :  { %261 = vst [vmem:[%s463_s2 + $0x18] sm:$0xff] %v245_v23  ;;  %v207_v31 = vpop.permute.xlu2 %206  ;;  %v167_v33 = vpop.permute.xlu1 %166 }
  0xaf   :  { %260 = vst [vmem:[%s463_s2 + $0x10] sm:$0xff] %v244_v24  ;;  %v225_v19 = vsub.f32 %v207_v31, %v366_v30  ;;  %v215_v34 = vsub.f32 %v167_v33, %v366_v30  ;;  %v175_v35 = vpop.permute.xlu0 %174 }
  0xb0   :  { %v217_v36 = vsub.f32 %v175_v35, %v366_v30 }
  0xb1   :  { %v241_v32 = vmul.f32 %v225_v19, %v225_v19  ;;  %v231_v39 = vmul.f32 %v215_v34, %v215_v34 }
  0xb2   :  { %v233_v42 = vmul.f32 %v217_v36, %v217_v36 }
  0xb3   :  { %v257_v43 = vadd.f32 %v241_v32, %v144_v38  ;;  %v247_v44 = vadd.f32 %v231_v39, %v134_v37 }
  0xb4   :  { %v249_v45 = vadd.f32 %v233_v42, %v136_v41 }
  0xb5   :  { %273 = vst [vmem:[%s463_s2 + $0x78] sm:$0xff] %v257_v43 }
  0xb6   :  { %263 = vst [vmem:[%s463_s2 + $0x28] sm:$0xff] %v247_v44  ;;  %v179_v49 = vpop.permute.xlu1 %178 }
  0xb7   :  { %265 = vst [vmem:[%s463_s2 + $0x38] sm:$0xff] %v249_v45  ;;  %v218_v50 = vsub.f32 %v179_v49, %v366_v30  ;;  %v187_v51 = vpop.permute.xlu0 %186 }
  0xb8   :  { %v220_v20 = vsub.f32 %v187_v51, %v366_v30 }
  0xb9   :  { %v234_v53 = vmul.f32 %v218_v50, %v218_v50 }
  0xba   :  { %v236_v55 = vmul.f32 %v220_v20, %v220_v20 }
  0xbb   :  { %v250_v56 = vadd.f32 %v234_v53, %v137_v52 }
  0xbc   :  { %v252_v40 = vadd.f32 %v236_v55, %v139_v54 }
  0xbd   :  { %266 = vst [vmem:[%s463_s2 + $0x40] sm:$0xff] %v250_v56 }
  0xbe   :  { %268 = vst [vmem:[%s463_s2 + $0x50] sm:$0xff] %v252_v40  ;;  %v191_v59 = vpop.permute.xlu1 %190 }
  0xbf   :  { %v221_v60 = vsub.f32 %v191_v59, %v366_v30  ;;  %v199_v61 = vpop.permute.xlu0 %198 }
  0xc0   :  { %v223_v62 = vsub.f32 %v199_v61, %v366_v30 }
  0xc1   :  { %v237_v0 = vmul.f32 %v221_v60, %v221_v60 }
  0xc2   :  { %v239_v1 = vmul.f32 %v223_v62, %v223_v62 }
  0xc3   :  { %v253_v2 = vadd.f32 %v237_v0, %v140_v63 }
  0xc4   :  { %v255_v3 = vadd.f32 %v239_v1, %v142_v21 }
  0xc5   :  { %269 = vst [vmem:[%s463_s2 + $0x58] sm:$0xff] %v253_v2 }
  0xc6   :  { %271 = vst [vmem:[%s463_s2 + $0x68] sm:$0xff] %v255_v3  ;;  %v203_v25 = vpop.permute.xlu1 %202 }
  0xc7   :  { %v224_v48 = vsub.f32 %v203_v25, %v366_v30 }
  0xc9   :  { %v240_v5 = vmul.f32 %v224_v48, %v224_v48 }
  0xcb   :  { %v256_v6 = vadd.f32 %v240_v5, %v143_v4 }
  0xcd   :  { %272 = vst [vmem:[%s463_s2 + $0x70] sm:$0xff] %v256_v6 }

</bundles_post_ra>
